<compile_context>
chip_gen: v7x
topology: tpu7x:2x2x1
jax: 0.10.0
libtpu: 0.0.40
codegen_flags: <defaults>
</compile_context>

<pallas_src>
import jax
import jax.numpy as jnp
from jax.experimental import pallas as pl
from jax.experimental.pallas import tpu as pltpu

# ---- synthetic config (small) ----
VOCAB = 100
EMBED_DIM = 8                         # E
ITEM_NUM_FIELDS = 4                   # F
D = EMBED_DIM * ITEM_NUM_FIELDS       # gru_h_dim = 32
N_HEADS = 4
HIST_SESSION_NUM = 4                  # S
HIST_SESSION_LEN = 8                  # Ls
MAX_HIST_LEN = HIST_SESSION_NUM * HIST_SESSION_LEN
SESSION_LEN = 8                       # L
BATCH = 2

# ---- packed-weight layout (single (PACK_ROWS, 32) f32 array) ----
_SD = HIST_SESSION_NUM * D            # 128  (lane width of the hist slab)
_SH = HIST_SESSION_NUM * N_HEADS      # 16
_W1_R0 = 0                            # rows   0:128 -> block-diag fc1 (128,32)
_W2_R0 = _SD                          # rows 128:160 -> block-diag fc2 (32,16)
_W3_R0 = _SD + D                      # rows 160:224 -> fc3 [W3u; W3s] (64,32)
_B1_ROW = _SD + 3 * D                 # row  224     -> b1 tiled over sessions
_B2_ROW = _B1_ROW + 8                 # row  232     -> b2 tiled over sessions
_B3_ROW = _B2_ROW + 8                 # row  240     -> b3
PACK_ROWS = _B3_ROW + 8               # 248


def miss_kernel(hist_ref, sess_ref, item_ref, wpk_ref, out_ref):
    """One batch tile.

    hist_ref : (TB, S*D=128) pooled history sessions, lane = s*D + d
    sess_ref : (TB, D)       current-session mean representation
    item_ref : (TB, D)       target item embedding
    wpk_ref  : (PACK_ROWS,D) packed weights / biases
    out_ref  : (TB, 1)       sigmoid(logit)
    """
    S, H = HIST_SESSION_NUM, N_HEADS

    hist = hist_ref[...]                                    # (TB, 128)
    sess = sess_ref[...]                                    # (TB, 32)
    item = item_ref[...]                                    # (TB, 32)

    w1 = wpk_ref[_W1_R0:_W1_R0 + _SD, :]                    # (128, 32) blk-diag
    w2 = wpk_ref[_W2_R0:_W2_R0 + D, 0:_SH]                  # (32, 16)  blk-diag
    w3 = wpk_ref[_W3_R0:_W3_R0 + 2 * D, :]                  # (64, 32)
    b1 = wpk_ref[_B1_ROW:_B1_ROW + 1, :]                    # (1, 32)
    b2 = wpk_ref[_B2_ROW:_B2_ROW + 1, 0:_SH]                # (1, 16)
    b3 = wpk_ref[_B3_ROW:_B3_ROW + 1, :]                    # (1, 32)

    # fc2(tanh(fc1(.))) over all S sessions in two MXU pushes (block-diag W1/W2).
    h1 = jnp.tanh(jnp.dot(hist, w1, preferred_element_type=jnp.float32) + b1)
    att = jnp.dot(h1, w2, preferred_element_type=jnp.float32) + b2   # (TB, S*H)

    # softmax over the session axis (torch Softmax(dim=1)), per head:
    # elementwise across S per-session (TB, H) tiles, one approx reciprocal.
    a = [att[:, s * H:(s + 1) * H] for s in range(S)]        # S x (TB, H)
    m = a[0]
    for x in a[1:]:
        m = jnp.maximum(m, x)
    e = [jnp.exp(x - m) for x in a]
    den = e[0]
    for x in e[1:]:
        den = den + x
    inv = pl.reciprocal(den, approx=True)
    aw = [x * inv for x in e]                                # S x (TB, H)

    hs = [hist[:, s * D:(s + 1) * D] for s in range(S)]      # S x (TB, D)

    # latent_user_reps is never materialized:
    #   score[b,h]  = <latent_h, sess>           = sum_s aw[b,s,h] * <hist_s, sess>
    #   user_emb[b] = sum_h ua[b,h] * latent_h   = sum_s (sum_h ua[b,h] aw[b,s,h]) * hist_s
    hd = [jnp.sum(h * sess, axis=1, keepdims=True) for h in hs]   # S x (TB, 1)

    sc = aw[0] * hd[0]
    for s in range(1, S):
        sc = sc + aw[s] * hd[s]                              # (TB, H)

    # softmax over heads
    m2 = jnp.max(sc, axis=1, keepdims=True)
    e2 = jnp.exp(sc - m2)
    ua = e2 * pl.reciprocal(jnp.sum(e2, axis=1, keepdims=True), approx=True)

    # user_emb = sum_s c_s * hist_s with c_s = <ua, aw_s> over heads
    ue = jnp.zeros_like(sess)
    for s in range(S):
        c_s = jnp.sum(ua * aw[s], axis=1, keepdims=True)     # (TB, 1)
        ue = ue + c_s * hs[s]                                # (TB, D)

    # fc3(cat(user_emb, sess_reps)) -- single (TB,64)@(64,32) MXU push
    z = jnp.dot(jnp.concatenate([ue, sess], axis=1), w3,
                preferred_element_type=jnp.float32) + b3     # (TB, D)

    logit = jnp.sum(z * item, axis=1, keepdims=True)         # (TB, 1)
    out_ref[...] = jax.nn.sigmoid(logit)


def _round_up(x, m):
    return (x + m - 1) // m * m


def _pack_weights(params):
    """Block-diagonal fc1/fc2, combined fc3, biases -> one (PACK_ROWS, D) array."""
    S = HIST_SESSION_NUM
    eye = jnp.eye(S, dtype=jnp.float32)
    w1_bd = jnp.kron(eye, params['w1'].astype(jnp.float32))          # (128, 32)
    w2_bd = jnp.kron(eye, params['w2'].astype(jnp.float32))          # (32, 16)
    w3 = jnp.concatenate([params['w3u'], params['w3s']], axis=0)     # (64, 32)
    b1_t = jnp.tile(params['b1'], (1, S))                            # (1, 32)
    b2_t = jnp.tile(params['b2'], (1, S))                            # (1, 16)

    wpk = jnp.zeros((PACK_ROWS, D), jnp.float32)
    wpk = wpk.at[_W1_R0:_W1_R0 + _SD, :].set(w1_bd)
    wpk = wpk.at[_W2_R0:_W2_R0 + D, 0:_SH].set(w2_bd)
    wpk = wpk.at[_W3_R0:_W3_R0 + 2 * D, :].set(w3.astype(jnp.float32))
    wpk = wpk.at[_B1_ROW, :].set(b1_t[0])
    wpk = wpk.at[_B2_ROW, 0:_SH].set(b2_t[0])
    wpk = wpk.at[_B3_ROW, :].set(params['b3'][0].astype(jnp.float32))
    return wpk


def miss_forward(params, x_item, user_hist, x_session, *,
                 batch_tile=None, core_parallel=False):
    """Embedding gather + session pooling fused in the XLA prologue; the
    attention / fc hot path runs in a Pallas kernel tiled over the batch with a
    lane-dense (B, 128) history layout."""
    table = params['emb']
    # drop the last field column (as in the PyTorch forward)
    user_hist = user_hist[:, :, :-1]
    x_session = x_session[:, :, :-1]

    B = x_item.shape[0]
    L = x_session.shape[1]
    S, Ls = HIST_SESSION_NUM, HIST_SESSION_LEN

    # Batch tile: multiple of 8 sublanes, big enough to amortize the ~0.35us
    # per-grid-step overhead; 1024 keeps peak live intermediates + I/O buffers
    # well inside VMEM on v5e/v6e/v7x (raise via batch_tile= if desired).
    if batch_tile is None:
        batch_tile = min(_round_up(B, 8), 1024)
    tb = batch_tile
    bp = _round_up(B, tb)

    # Pad only the tiny INTEGER index inputs; the gather then directly produces
    # padded-size float arrays (no extra full HBM read+write of big inputs).
    if bp != B:
        pad = bp - B
        x_item = jnp.pad(x_item, ((0, pad), (0, 0)))
        user_hist = jnp.pad(user_hist, ((0, pad), (0, 0), (0, 0)))
        x_session = jnp.pad(x_session, ((0, pad), (0, 0), (0, 0)))

    # Embedding gather + mean pooling (fuses in XLA, ~8x fewer bytes to kernel).
    item_emb = table[x_item].astype(jnp.float32).reshape(bp, D)           # (bp, 32)
    hist128 = jnp.mean(
        table[user_hist].astype(jnp.float32).reshape(bp, S, Ls, D), axis=2
    ).reshape(bp, S * D)          # lane-dense (bp, 128); plain reshape, no transpose
    sess_reps = jnp.mean(
        table[x_session].astype(jnp.float32).reshape(bp, L, D), axis=1)   # (bp, 32)

    wpk = _pack_weights(params)

    grid = (bp // tb,)
    # "parallel" by default; set core_parallel=True to force sharding of the
    # batch grid axis across v7x's 2 TensorCores if plain parallel is a no-op.
    sem = (pltpu.CORE_PARALLEL,) if core_parallel else ("parallel",)

    out = pl.pallas_call(
        miss_kernel,
        out_shape=jax.ShapeDtypeStruct((bp, 1), jnp.float32),
        grid=grid,
        in_specs=[
            pl.BlockSpec((tb, S * D), lambda i: (i, 0)),       # hist  (lane-dense)
            pl.BlockSpec((tb, D), lambda i: (i, 0)),           # sess_reps
            pl.BlockSpec((tb, D), lambda i: (i, 0)),           # item_emb
            pl.BlockSpec((PACK_ROWS, D), lambda i: (0, 0)),    # packed weights
        ],
        out_specs=pl.BlockSpec((tb, 1), lambda i: (i, 0)),
        compiler_params=pltpu.CompilerParams(
            dimension_semantics=sem,
            vmem_limit_bytes=48 * 1024 * 1024),
    )(hist128, sess_reps, item_emb, wpk)

    # PyTorch forward returns (sigmoid(out), score=None); score is always None.
    return out[:B, 0]


def miss_reference(params, x_item, user_hist, x_session):
    """Pure-JAX mirror of the PyTorch forward (for correctness check)."""
    table = params['emb']
    user_hist = user_hist[:, :, :-1]
    x_session = x_session[:, :, :-1]
    B = x_item.shape[0]
    item_emb = table[x_item].reshape(B, -1)
    uh = table[user_hist].reshape(B, user_hist.shape[1], -1)
    hist_sessions = jnp.mean(
        uh.reshape(B, HIST_SESSION_NUM, HIST_SESSION_LEN, D), axis=2)
    att = jnp.tanh(hist_sessions @ params['w1'] + params['b1'][0]) \
        @ params['w2'] + params['b2'][0]
    att = jax.nn.softmax(att, axis=1)
    tiled = jnp.tile(hist_sessions, (1, 1, N_HEADS)).reshape(
        B, HIST_SESSION_NUM, N_HEADS, D)
    latent = jnp.sum(att[..., None] * tiled, axis=1)
    xs = table[x_session].reshape(B, x_session.shape[1], -1)
    xs_reps = jnp.mean(xs, axis=1)
    ua = jax.nn.softmax(jnp.einsum('bhd,bd->bh', latent, xs_reps), axis=1)
    user_emb = jnp.sum(ua[..., None] * latent, axis=1)
    zcat = jnp.concatenate([user_emb, xs_reps], axis=1)
    w3 = jnp.concatenate([params['w3u'], params['w3s']], axis=0)
    z_u = zcat @ w3 + params['b3'][0]
    return jax.nn.sigmoid(jnp.sum(z_u * item_emb, axis=1))


if __name__ == "__main__":
    key = jax.random.PRNGKey(0)
    ks = jax.random.split(key, 11)
    params = {
        'emb': 0.1 * jax.random.normal(ks[0], (VOCAB, EMBED_DIM), jnp.float32),
        'w1':  0.1 * jax.random.normal(ks[1], (D, EMBED_DIM), jnp.float32),
        'b1':  0.1 * jax.random.normal(ks[2], (1, EMBED_DIM), jnp.float32),
        'w2':  0.1 * jax.random.normal(ks[3], (EMBED_DIM, N_HEADS), jnp.float32),
        'b2':  0.1 * jax.random.normal(ks[4], (1, N_HEADS), jnp.float32),
        'w3u': 0.1 * jax.random.normal(ks[5], (D, D), jnp.float32),
        'w3s': 0.1 * jax.random.normal(ks[6], (D, D), jnp.float32),
        'b3':  0.1 * jax.random.normal(ks[7], (1, D), jnp.float32),
    }
    x_item = jax.random.randint(ks[8], (BATCH, ITEM_NUM_FIELDS), 0, VOCAB)
    user_hist = jax.random.randint(
        ks[9], (BATCH, MAX_HIST_LEN, ITEM_NUM_FIELDS + 1), 0, VOCAB)
    x_session = jax.random.randint(
        ks[10], (BATCH, SESSION_LEN, ITEM_NUM_FIELDS + 1), 0, VOCAB)

    fwd = jax.jit(miss_forward)
    out = jax.block_until_ready(fwd(params, x_item, user_hist, x_session))
    ref = miss_reference(params, x_item, user_hist, x_session)

    assert out.shape == (BATCH,)
    # tolerance loosened from 1e-5 because both softmax normalisations use the
    # EUP approximate reciprocal (pl.reciprocal(..., approx=True)).
    assert bool(jnp.allclose(out, ref, atol=5e-3, rtol=5e-3)), (out, ref)
    print("KERNEL_OK")
</pallas_src>

<mosaic_0001>
module attributes {stable_mosaic.version = 11 : i64} {
  func.func @miss_kernel(%arg0: i32, %arg1: memref<8x128xf32, #tpu.memory_space<vmem>>, %arg2: memref<8x32xf32, #tpu.memory_space<vmem>>, %arg3: memref<8x32xf32, #tpu.memory_space<vmem>>, %arg4: memref<248x32xf32, #tpu.memory_space<vmem>>, %arg5: memref<8x1xf32, #tpu.memory_space<vmem>>) attributes {dimension_semantics = [#tpu.dimension_semantics<parallel>], iteration_bounds = array<i64: 1>, scalar_prefetch = 0 : i64, scratch_operands = 0 : i64, tpu.core_type = #tpu.core_type<tc>, window_params = [{transform_indices = @transform_0, window_bounds = array<i64: 8, 128>}, {transform_indices = @transform_1, window_bounds = array<i64: 8, 32>}, {transform_indices = @transform_2, window_bounds = array<i64: 8, 32>}, {pipeline_mode = #tpu.pipeline_mode<synchronous>, transform_indices = @transform_3, window_bounds = array<i64: 248, 32>}, {transform_indices = @transform_4, window_bounds = array<i64: 8, 1>}]} {
    %c0 = arith.constant 0 : index
    %c0_0 = arith.constant 0 : index
    %0 = vector.load %arg1[%c0, %c0_0] : memref<8x128xf32, #tpu.memory_space<vmem>>, vector<8x128xf32>
    %c0_1 = arith.constant 0 : index
    %c0_2 = arith.constant 0 : index
    %1 = vector.load %arg2[%c0_1, %c0_2] : memref<8x32xf32, #tpu.memory_space<vmem>>, vector<8x32xf32>
    %c0_3 = arith.constant 0 : index
    %c0_4 = arith.constant 0 : index
    %2 = vector.load %arg3[%c0_3, %c0_4] : memref<8x32xf32, #tpu.memory_space<vmem>>, vector<8x32xf32>
    %c0_5 = arith.constant 0 : index
    %c0_6 = arith.constant 0 : index
    %3 = vector.load %arg4[%c0_5, %c0_6] : memref<248x32xf32, #tpu.memory_space<vmem>>, vector<128x32xf32>
    %c128 = arith.constant 128 : index
    %c0_7 = arith.constant 0 : index
    %4 = vector.load %arg4[%c128, %c0_7] : memref<248x32xf32, #tpu.memory_space<vmem>>, vector<32x16xf32>
    %c160 = arith.constant 160 : index
    %c0_8 = arith.constant 0 : index
    %5 = vector.load %arg4[%c160, %c0_8] : memref<248x32xf32, #tpu.memory_space<vmem>>, vector<64x32xf32>
    %c224 = arith.constant 224 : index
    %c0_9 = arith.constant 0 : index
    %6 = vector.load %arg4[%c224, %c0_9] : memref<248x32xf32, #tpu.memory_space<vmem>>, vector<1x32xf32>
    %c232 = arith.constant 232 : index
    %c0_10 = arith.constant 0 : index
    %7 = vector.load %arg4[%c232, %c0_10] : memref<248x32xf32, #tpu.memory_space<vmem>>, vector<1x16xf32>
    %c240 = arith.constant 240 : index
    %c0_11 = arith.constant 0 : index
    %8 = vector.load %arg4[%c240, %c0_11] : memref<248x32xf32, #tpu.memory_space<vmem>>, vector<1x32xf32>
    %cst = arith.constant dense<0.000000e+00> : vector<8x32xf32>
    %9 = tpu.matmul %0, %3, %cst {dimension_numbers = #tpu.dot_dimension_numbers<[1], [0], [0], [1], [0, 0, 1, 1], [], []>} : vector<8x128xf32>, vector<128x32xf32>, vector<8x32xf32> -> vector<8x32xf32>
    %10 = vector.broadcast %6 : vector<1x32xf32> to vector<8x32xf32>
    %11 = arith.addf %9, %10 : vector<8x32xf32>
    %12 = math.tanh %11 : vector<8x32xf32>
    %cst_12 = arith.constant dense<0.000000e+00> : vector<8x16xf32>
    %13 = tpu.matmul %12, %4, %cst_12 {dimension_numbers = #tpu.dot_dimension_numbers<[1], [0], [0], [1], [0, 0, 1, 1], [], []>} : vector<8x32xf32>, vector<32x16xf32>, vector<8x16xf32> -> vector<8x16xf32>
    %14 = vector.broadcast %7 : vector<1x16xf32> to vector<8x16xf32>
    %15 = arith.addf %13, %14 : vector<8x16xf32>
    %16 = vector.extract_strided_slice %15 {offsets = [0, 0], sizes = [8, 4], strides = [1, 1]} : vector<8x16xf32> to vector<8x4xf32>
    %17 = vector.extract_strided_slice %15 {offsets = [0, 4], sizes = [8, 4], strides = [1, 1]} : vector<8x16xf32> to vector<8x4xf32>
    %18 = vector.extract_strided_slice %15 {offsets = [0, 8], sizes = [8, 4], strides = [1, 1]} : vector<8x16xf32> to vector<8x4xf32>
    %19 = vector.extract_strided_slice %15 {offsets = [0, 12], sizes = [8, 4], strides = [1, 1]} : vector<8x16xf32> to vector<8x4xf32>
    %20 = arith.maximumf %16, %17 : vector<8x4xf32>
    %21 = arith.maximumf %20, %18 : vector<8x4xf32>
    %22 = arith.maximumf %21, %19 : vector<8x4xf32>
    %23 = arith.subf %16, %22 : vector<8x4xf32>
    %24 = math.exp %23 : vector<8x4xf32>
    %25 = arith.subf %17, %22 : vector<8x4xf32>
    %26 = math.exp %25 : vector<8x4xf32>
    %27 = arith.subf %18, %22 : vector<8x4xf32>
    %28 = math.exp %27 : vector<8x4xf32>
    %29 = arith.subf %19, %22 : vector<8x4xf32>
    %30 = math.exp %29 : vector<8x4xf32>
    %31 = arith.addf %24, %26 : vector<8x4xf32>
    %32 = arith.addf %31, %28 : vector<8x4xf32>
    %33 = arith.addf %32, %30 : vector<8x4xf32>
    %34 = tpu.reciprocal %33 {approx = true} : vector<8x4xf32> -> vector<8x4xf32>
    %35 = arith.mulf %24, %34 : vector<8x4xf32>
    %36 = arith.mulf %26, %34 : vector<8x4xf32>
    %37 = arith.mulf %28, %34 : vector<8x4xf32>
    %38 = arith.mulf %30, %34 : vector<8x4xf32>
    %39 = vector.extract_strided_slice %0 {offsets = [0, 0], sizes = [8, 32], strides = [1, 1]} : vector<8x128xf32> to vector<8x32xf32>
    %40 = vector.extract_strided_slice %0 {offsets = [0, 32], sizes = [8, 32], strides = [1, 1]} : vector<8x128xf32> to vector<8x32xf32>
    %41 = vector.extract_strided_slice %0 {offsets = [0, 64], sizes = [8, 32], strides = [1, 1]} : vector<8x128xf32> to vector<8x32xf32>
    %42 = vector.extract_strided_slice %0 {offsets = [0, 96], sizes = [8, 32], strides = [1, 1]} : vector<8x128xf32> to vector<8x32xf32>
    %43 = arith.mulf %39, %1 : vector<8x32xf32>
    %cst_13 = arith.constant dense<0.000000e+00> : vector<8xf32>
    %44 = vector.multi_reduction <add>, %43, %cst_13 [1] : vector<8x32xf32> to vector<8xf32>
    %45 = vector.shape_cast %44 : vector<8xf32> to vector<8x1xf32>
    %46 = arith.mulf %40, %1 : vector<8x32xf32>
    %cst_14 = arith.constant dense<0.000000e+00> : vector<8xf32>
    %47 = vector.multi_reduction <add>, %46, %cst_14 [1] : vector<8x32xf32> to vector<8xf32>
    %48 = vector.shape_cast %47 : vector<8xf32> to vector<8x1xf32>
    %49 = arith.mulf %41, %1 : vector<8x32xf32>
    %cst_15 = arith.constant dense<0.000000e+00> : vector<8xf32>
    %50 = vector.multi_reduction <add>, %49, %cst_15 [1] : vector<8x32xf32> to vector<8xf32>
    %51 = vector.shape_cast %50 : vector<8xf32> to vector<8x1xf32>
    %52 = arith.mulf %42, %1 : vector<8x32xf32>
    %cst_16 = arith.constant dense<0.000000e+00> : vector<8xf32>
    %53 = vector.multi_reduction <add>, %52, %cst_16 [1] : vector<8x32xf32> to vector<8xf32>
    %54 = vector.shape_cast %53 : vector<8xf32> to vector<8x1xf32>
    %55 = vector.broadcast %45 : vector<8x1xf32> to vector<8x4xf32>
    %56 = arith.mulf %35, %55 : vector<8x4xf32>
    %57 = vector.broadcast %48 : vector<8x1xf32> to vector<8x4xf32>
    %58 = arith.mulf %36, %57 : vector<8x4xf32>
    %59 = arith.addf %56, %58 : vector<8x4xf32>
    %60 = vector.broadcast %51 : vector<8x1xf32> to vector<8x4xf32>
    %61 = arith.mulf %37, %60 : vector<8x4xf32>
    %62 = arith.addf %59, %61 : vector<8x4xf32>
    %63 = vector.broadcast %54 : vector<8x1xf32> to vector<8x4xf32>
    %64 = arith.mulf %38, %63 : vector<8x4xf32>
    %65 = arith.addf %62, %64 : vector<8x4xf32>
    %cst_17 = arith.constant dense<0xFF800000> : vector<8xf32>
    %66 = vector.multi_reduction <maximumf>, %65, %cst_17 [1] : vector<8x4xf32> to vector<8xf32>
    %67 = vector.shape_cast %66 : vector<8xf32> to vector<8x1xf32>
    %68 = vector.broadcast %67 : vector<8x1xf32> to vector<8x4xf32>
    %69 = arith.subf %65, %68 : vector<8x4xf32>
    %70 = math.exp %69 : vector<8x4xf32>
    %cst_18 = arith.constant dense<0.000000e+00> : vector<8xf32>
    %71 = vector.multi_reduction <add>, %70, %cst_18 [1] : vector<8x4xf32> to vector<8xf32>
    %72 = vector.shape_cast %71 : vector<8xf32> to vector<8x1xf32>
    %73 = tpu.reciprocal %72 {approx = true} : vector<8x1xf32> -> vector<8x1xf32>
    %74 = vector.broadcast %73 : vector<8x1xf32> to vector<8x4xf32>
    %75 = arith.mulf %70, %74 : vector<8x4xf32>
    %cst_19 = arith.constant 0.000000e+00 : f32
    %76 = vector.broadcast %cst_19 : f32 to vector<8x32xf32>
    %77 = arith.mulf %75, %35 : vector<8x4xf32>
    %cst_20 = arith.constant dense<0.000000e+00> : vector<8xf32>
    %78 = vector.multi_reduction <add>, %77, %cst_20 [1] : vector<8x4xf32> to vector<8xf32>
    %79 = vector.shape_cast %78 : vector<8xf32> to vector<8x1xf32>
    %80 = vector.broadcast %79 : vector<8x1xf32> to vector<8x32xf32>
    %81 = arith.mulf %80, %39 : vector<8x32xf32>
    %82 = arith.addf %76, %81 : vector<8x32xf32>
    %83 = arith.mulf %75, %36 : vector<8x4xf32>
    %cst_21 = arith.constant dense<0.000000e+00> : vector<8xf32>
    %84 = vector.multi_reduction <add>, %83, %cst_21 [1] : vector<8x4xf32> to vector<8xf32>
    %85 = vector.shape_cast %84 : vector<8xf32> to vector<8x1xf32>
    %86 = vector.broadcast %85 : vector<8x1xf32> to vector<8x32xf32>
    %87 = arith.mulf %86, %40 : vector<8x32xf32>
    %88 = arith.addf %82, %87 : vector<8x32xf32>
    %89 = arith.mulf %75, %37 : vector<8x4xf32>
    %cst_22 = arith.constant dense<0.000000e+00> : vector<8xf32>
    %90 = vector.multi_reduction <add>, %89, %cst_22 [1] : vector<8x4xf32> to vector<8xf32>
    %91 = vector.shape_cast %90 : vector<8xf32> to vector<8x1xf32>
    %92 = vector.broadcast %91 : vector<8x1xf32> to vector<8x32xf32>
    %93 = arith.mulf %92, %41 : vector<8x32xf32>
    %94 = arith.addf %88, %93 : vector<8x32xf32>
    %95 = arith.mulf %75, %38 : vector<8x4xf32>
    %cst_23 = arith.constant dense<0.000000e+00> : vector<8xf32>
    %96 = vector.multi_reduction <add>, %95, %cst_23 [1] : vector<8x4xf32> to vector<8xf32>
    %97 = vector.shape_cast %96 : vector<8xf32> to vector<8x1xf32>
    %98 = vector.broadcast %97 : vector<8x1xf32> to vector<8x32xf32>
    %99 = arith.mulf %98, %42 : vector<8x32xf32>
    %100 = arith.addf %94, %99 : vector<8x32xf32>
    %101 = tpu.concatenate %100, %1 in 1 : vector<8x32xf32>, vector<8x32xf32> -> vector<8x64xf32>
    %cst_24 = arith.constant dense<0.000000e+00> : vector<8x32xf32>
    %102 = tpu.matmul %101, %5, %cst_24 {dimension_numbers = #tpu.dot_dimension_numbers<[1], [0], [0], [1], [0, 0, 1, 1], [], []>} : vector<8x64xf32>, vector<64x32xf32>, vector<8x32xf32> -> vector<8x32xf32>
    %103 = vector.broadcast %8 : vector<1x32xf32> to vector<8x32xf32>
    %104 = arith.addf %102, %103 : vector<8x32xf32>
    %105 = arith.mulf %104, %2 : vector<8x32xf32>
    %cst_25 = arith.constant dense<0.000000e+00> : vector<8xf32>
    %106 = vector.multi_reduction <add>, %105, %cst_25 [1] : vector<8x32xf32> to vector<8xf32>
    %107 = vector.shape_cast %106 : vector<8xf32> to vector<8x1xf32>
    %108 = arith.negf %107 : vector<8x1xf32>
    %109 = math.exp %108 : vector<8x1xf32>
    %cst_26 = arith.constant 1.000000e+00 : f32
    %110 = vector.broadcast %cst_26 : f32 to vector<8x1xf32>
    %111 = arith.addf %110, %109 : vector<8x1xf32>
    %112 = arith.divf %110, %111 : vector<8x1xf32>
    %c0_27 = arith.constant 0 : index
    %c0_28 = arith.constant 0 : index
    %113 = vector.load %arg5[%c0_27, %c0_28] : memref<8x1xf32, #tpu.memory_space<vmem>>, vector<8x1xf32>
    tpu.vector_store %arg5[%c0_27, %c0_28], %112 {strides = array<i32>} : memref<8x1xf32, #tpu.memory_space<vmem>>, vector<8x1xf32>,
    return
  }
  func.func @transform_0(%arg0: i32) -> (i32, i32) {
    %c0_i32 = arith.constant 0 : i32
    %c0_i32_0 = arith.constant 0 : i32
    return %arg0, %c0_i32 : i32, i32
  }
  func.func @transform_1(%arg0: i32) -> (i32, i32) {
    %c0_i32 = arith.constant 0 : i32
    %c0_i32_0 = arith.constant 0 : i32
    return %arg0, %c0_i32 : i32, i32
  }
  func.func @transform_2(%arg0: i32) -> (i32, i32) {
    %c0_i32 = arith.constant 0 : i32
    %c0_i32_0 = arith.constant 0 : i32
    return %arg0, %c0_i32 : i32, i32
  }
  func.func @transform_3(%arg0: i32) -> (i32, i32) {
    %c0_i32 = arith.constant 0 : i32
    %c0_i32_0 = arith.constant 0 : i32
    %c0_i32_1 = arith.constant 0 : i32
    return %c0_i32, %c0_i32_0 : i32, i32
  }
  func.func @transform_4(%arg0: i32) -> (i32, i32) {
    %c0_i32 = arith.constant 0 : i32
    %c0_i32_0 = arith.constant 0 : i32
    return %arg0, %c0_i32 : i32, i32
  }
}

</mosaic_0001>

<bundles_post_ra>
// kernel: miss_forward.1
= control target key start
LH: loop header
LB: loop body
LE: loop exit
PB: predicated region body
PF: predicated region fallthrough
CT: control target
= control target key end

     0   :  { %v657_v0 = vmov 0.0|0.0   ;;  %vm658_vm0 = vmmov 0   ;;  %v659_v4 = vmov 0.0   ;;  %vm130_vm1 = vcmask 261120   ;;  %s660_s8 = smov 116   ;;  %s661_s9 = smov 124   ;;  %s871_s3 = inlined_call_operand.vmem [shape: f32[248,32], index: 3, kind: input, shape index: {}]   ;;  %s872_s0 = inlined_call_operand.vmem [shape: f32[8,128], index: 0, kind: input, shape index: {}]   ;;  %s873_s1 = inlined_call_operand.vmem [shape: f32[8,32], index: 1, kind: input, shape index: {}]   ;;  %s874_s2 = inlined_call_operand.vmem [shape: f32[8,32], index: 2, kind: input, shape index: {}]   ;;  %s875_s4 = inlined_call_operand.vmem [shape: f32[8,1], index: 4, kind: output, shape index: {}]  }
   0x1   :  { %583 = vmatprep.subr.bf16.mxu0 %v657_v0  ;;  %v20_v1 = vld [vmem:[%s871_s3] sm:$0xff]  ;;  %v21_v2 = vld [vmem:[%s871_s3 + $0x8] sm:$0xff]  ;;  %v22_v3 = vld [vmem:[%s871_s3 + $0x10] sm:$0xff]  ;;  %550 = vmatprep.mubr.msk.f32.mxu0 %vm658_vm0, %v659_v4  ;;  %s662_s10 = smov 120   ;;  %s663_s11 = smov 8   ;;  %vm326_vm2 = vcmask 31744  }
   0x2   :  { %v584_v5 = vpack.c.bf16 %v21_v2, %v20_v1  ;;  %v23_v6 = vld [vmem:[%s871_s3 + $0x18] sm:$0xff]  ;;  %607 = vmatprep.subr.bf16.mxu1 %v657_v0  ;;  %561 = vmatprep.mubr.msk.f32.mxu1 %vm658_vm0, %v659_v4  ;;  %v24_v8 = vld [vmem:[%s871_s3 + $0x20] sm:$0xff]  ;;  %v25_v9 = vld [vmem:[%s871_s3 + $0x28] sm:$0xff]  ;;  %s664_s12 = smov 4   ;;  %s665_s15 = smov 12   ;;  %vm391_vm3 = vcmask 523264  }
   0x3   :  { %v587_v7 = vpack.c.bf16 %v23_v6, %v22_v3  ;;  %v590_v10 = vpack.c.bf16 %v25_v9, %v24_v8  ;;  %v26_v11 = vld [vmem:[%s871_s3 + $0x30] sm:$0xff]  ;;  %v27_v12 = vld [vmem:[%s871_s3 + $0x38] sm:$0xff]  ;;  %v28_v14 = vld [vmem:[%s871_s3 + $0x40] sm:$0xff]  ;;  %s666_s16 = smov 32   ;;  %s667_s17 = smov 64   ;;  %vm475_vm4 = vcmask 7168  }
   0x4   :  { %585 = vmatpush3.bf16.msra.mxu0 %v584_v5  ;;  %v593_v13 = vpack.c.bf16 %v27_v12, %v26_v11  ;;  %v29_v15 = vld [vmem:[%s871_s3 + $0x48] sm:$0xff]  ;;  %v30_v17 = vld [vmem:[%s871_s3 + $0x50] sm:$0xff]  ;;  %v31_v18 = vld [vmem:[%s871_s3 + $0x58] sm:$0xff]  ;;  %s668_s18 = smov 96  }
   0x5   :  { %586 = vmatprep.subr.bf16.mxu0 %v657_v0  ;;  %v596_v16 = vpack.c.bf16 %v29_v15, %v28_v14  ;;  %v599_v19 = vpack.c.bf16 %v31_v18, %v30_v17  ;;  %v32_v20 = vld [vmem:[%s871_s3 + $0x60] sm:$0xff]  ;;  %v33_v21 = vld [vmem:[%s871_s3 + $0x68] sm:$0xff]  ;;  %v34_v23 = vld [vmem:[%s871_s3 + $0x70] sm:$0xff] }
   0x6   :  { %v602_v22 = vpack.c.bf16 %v33_v21, %v32_v20  ;;  %v35_v24 = vld [vmem:[%s871_s3 + $0x78] sm:$0xff]  ;;  %v756_v26 = vld [vmem:[%s872_s0] sm:$0xff]  ;;  %v37_v28 = vld [vmem:[%s871_s3 + $0x88] sm:$0xff] }
   0x7   :  { %v605_v25 = vpack.c.bf16 %v35_v24, %v34_v23  ;;  %v36_v27 = vld [vmem:[%s871_s3 + $0x80] sm:$0xff]  ;;  %v38_v29 = vld [vmem:[%s871_s3 + $0x90] sm:$0xff]  ;;  %v39_v31 = vld [vmem:[%s871_s3 + $0x98] sm:$0xff] }
   0x8   :  { %588 = vmatpush3.bf16.msra.mxu0 %v587_v7  ;;  %v608_v30 = vpack.c.bf16 %v37_v28, %v36_v27  ;;  %v611_v32 = vpack.c.bf16 %v39_v31, %v38_v29  ;;  %v481_v33 = vld [vmem:[%s871_s3 + $0xe0] ss:$0 sm:$0xff]  ;;  %v482_v38 = vld [vmem:[%s871_s3 + $0xe8] ss:$0 sm:$0xff] }
   0x9   :  { %589 = vmatprep.subr.bf16.mxu0 %v657_v0  ;;  %v18_v48 = vld [vmem:[%s873_s1] sm:$0xff] }
   0xa   :  { %609 = vmatpush3.bf16.msra.mxu1 %v608_v30  ;;  %v269_v21 = vmul.f32 %v18_v48, %v756_v26 }
   0xb   :  { %610 = vmatprep.subr.bf16.mxu1 %v657_v0 }
   0xc   :  { %591 = vmatpush3.bf16.msra.mxu0 %v590_v10 }
   0xd   :  { %592 = vmatprep.subr.bf16.mxu0 %v657_v0 }
   0xe   :  { %612 = vmatpush3.bf16.msra.mxu1 %v611_v32 }
   0xf   :  { %613 = vmatprep.subr.bf16.mxu1 %v657_v0 }
  0x10   :  { %594 = vmatpush3.bf16.msra.mxu0 %v593_v13 }
  0x11   :  { %595 = vmatprep.subr.bf16.mxu0 %v657_v0 }
  0x14   :  { %597 = vmatpush3.bf16.msra.mxu0 %v596_v16 }
  0x15   :  { %598 = vmatprep.subr.bf16.mxu0 %v657_v0 }
  0x18   :  { %600 = vmatpush3.bf16.msra.mxu0 %v599_v19 }
  0x19   :  { %601 = vmatprep.subr.bf16.mxu0 %v657_v0 }
  0x1c   :  { %603 = vmatpush3.bf16.msra.mxu0 %v602_v22  ;;  %v270_v22 = vsel %vm130_vm1, %v269_v21, 0.0 }
  0x1d   :  { %604 = vmatprep.subr.bf16.mxu0 %v657_v0 }
  0x20   :  { %606 = vmatpush3.bf16.msra.mxu0 %v605_v25 }
  0x23   :  { %551 = vmatmul.mubr.f32.vlgmr.msra.gmra.mrb[0].mxu0 %v756_v26 }
  0xf6   :  { %v121_v34 = vpop.f32.mrb[0].mxu0 }
  0xf7   :  { %v122_v35 = vadd.f32 %v481_v33, %v121_v34  ;;  %v552_v36 = vpop.f32.mrb[1].mxu0 }
  0xf9   :  { %637 = vtanh.f32 %v122_v35 }
 0x103   :  { %v638_v37 = vpop.eup %637 }
 0x104   :  { %562 = vmatmul.mubr.msk.f32.vlgmr.msra.gmra.mrb[0].mxu1 %vm130_vm1, %v638_v37 }
 0x105   :  { %580 = vmatprep.mubr.msk.f32.mxu1 %vm658_vm0, %v659_v4 }
 0x1d7   :  { %v200_v39 = vpop.f32.mrb[0].mxu1 }
 0x1d8   :  { %v201_v40 = vadd.f32 %v482_v38, %v200_v39  ;;  %v563_v41 = vpop.f32.mrb[1].mxu1 }
 0x1da   :  { %213 = vrot.lane.b32.xlu1 %v201_v40, %s660_s8  ;;  %205 = vrot.lane.b32.xlu0 %v201_v40, %s661_s9 }
 0x1de   :  { %209 = vrot.lane.b32.xlu0 %v201_v40, %s662_s10 }
 0x24c   :  { %v206_v42 = vpop.permute.xlu0 %205  ;;  %v214_v46 = vpop.permute.xlu1 %213 }
 0x24d   :  { %v208_v43 = vmax.f32 %v201_v40, %v206_v42 }
 0x250   :  { %v210_v44 = vpop.permute.xlu0 %209 }
 0x251   :  { %v212_v45 = vmax.f32 %v208_v43, %v210_v44 }
 0x253   :  { %v216_v47 = vmax.f32 %v212_v45, %v214_v46 }
 0x255   :  { %227 = vrot.lane.b32.xlu0 %v216_v47, %s663_s11  ;;  %221 = vrot.lane.b32.xlu1 %v216_v47, %s664_s12  ;;  %v217_v4 = vsub.f32 %v201_v40, %v216_v47 }
 0x257   :  { %v218_v5 = vmul.f32 1.442695, %v217_v4  ;;  %v42_v4 = vld [vmem:[%s871_s3 + $0xb0] sm:$0xff] }
 0x259   :  { %233 = vrot.lane.b32.xlu1 %v216_v47, %s665_s15  ;;  %274 = vrot.lane.b32.xlu0 %v18_v48, %s666_s16 }
 0x25d   :  { %285 = vrot.lane.b32.xlu1 %v18_v48, %s667_s17  ;;  %296 = vrot.lane.b32.xlu0 %v18_v48, %s668_s18 }
 0x2c7   :  { %v228_v49 = vpop.permute.xlu0 %227  ;;  %v222_v50 = vpop.permute.xlu1 %221 }
 0x2c8   :  { %v230_v51 = vsub.f32 %v201_v40, %v228_v49  ;;  %v224_v52 = vsub.f32 %v201_v40, %v222_v50 }
 0x2ca   :  { %v231_v53 = vmul.f32 1.442695, %v230_v51  ;;  %v225_v54 = vmul.f32 1.442695, %v224_v52 }
 0x2cb   :  { %v234_v55 = vpop.permute.xlu1 %233  ;;  %v793_v58 = vpop.permute.xlu0 %274 }
 0x2cc   :  { %639 = vpow2.f32 %v231_v53  ;;  %v236_v56 = vsub.f32 %v201_v40, %v234_v55  ;;  %v277_v61 = vmul.f32 %v793_v58, %v756_v26 }
 0x2cd   :  { %641 = vpow2.f32 %v225_v54 }
 0x2ce   :  { %v237_v57 = vmul.f32 1.442695, %v236_v56 }
 0x2cf   :  { %v297_v62 = vpop.permute.xlu0 %296  ;;  %v286_v63 = vpop.permute.xlu1 %285 }
 0x2d0   :  { %643 = vpow2.f32 %v237_v57  ;;  %v299_v2 = vmul.f32 %v297_v62, %v756_v26  ;;  %v288_v3 = vmul.f32 %v286_v63, %v756_v26 }
 0x2d1   :  { %645 = vpow2.f32 %v218_v5 }
 0x2d6   :  { %v640_v59 = vpop.eup %639 }
 0x2d7   :  { %v642_v60 = vpop.eup %641  ;;  %245 = vrot.lane.b32.xlu0 %v640_v59, %s662_s10 }
 0x2d8   :  { %240 = vrot.lane.b32.xlu1 %v642_v60, %s661_s9 }
 0x2da   :  { %v644_v1 = vpop.eup %643 }
 0x2db   :  { %279 = vrot.lane.b32.xlu0 %v277_v61, %s668_s18  ;;  %v646_v7 = vpop.eup %645 }
 0x2dc   :  { %250 = vrot.lane.b32.xlu1 %v644_v1, %s660_s8 }
 0x2df   :  { %301 = vrot.lane.b32.xlu0 %v299_v2, %s666_s16  ;;  %v40_v2 = vld [vmem:[%s871_s3 + $0xa0] sm:$0xff] }
 0x2e0   :  { %290 = vrot.lane.b32.xlu1 %v288_v3, %s667_s17  ;;  %v41_v3 = vld [vmem:[%s871_s3 + $0xa8] sm:$0xff] }
 0x2e1   :  { %v614_v5 = vpack.c.bf16 %v41_v3, %v40_v2 }
 0x2e3   :  { %615 = vmatpush3.bf16.msra.mxu1 %v614_v5 }
 0x2e4   :  { %616 = vmatprep.subr.bf16.mxu1 %v657_v0 }
 0x349   :  { %v246_v6 = vpop.permute.xlu0 %245 }
 0x34a   :  { %v241_v8 = vpop.permute.xlu1 %240 }
 0x34b   :  { %v243_v9 = vadd.f32 %v646_v7, %v241_v8  ;;  %v44_v8 = vld [vmem:[%s871_s3 + $0xc0] sm:$0xff] }
 0x34d   :  { %v280_v10 = vpop.permute.xlu0 %279  ;;  %v248_v11 = vadd.f32 %v246_v6, %v243_v9  ;;  %v43_v6 = vld [vmem:[%s871_s3 + $0xb8] sm:$0xff]  ;;  %v45_v9 = vld [vmem:[%s871_s3 + $0xc8] sm:$0xff] }
 0x34e   :  { %v251_v12 = vpop.permute.xlu1 %250  ;;  %v282_v13 = vsel %vm130_vm1, %v280_v10, 0.0  ;;  %v620_v10 = vpack.c.bf16 %v45_v9, %v44_v8 }
 0x34f   :  { %v253_v14 = vadd.f32 %v251_v12, %v248_v11  ;;  %283 = vadd.xlane.f32.xlu1 %v282_v13  ;;  %v46_v11 = vld [vmem:[%s871_s3 + $0xd0] sm:$0xff]  ;;  %v47_v12 = vld [vmem:[%s871_s3 + $0xd8] sm:$0xff] }
 0x350   :  { %v623_v13 = vpack.c.bf16 %v47_v12, %v46_v11 }
 0x351   :  { %647 = vrcp.f32 %v253_v14  ;;  %v302_v16 = vpop.permute.xlu0 %301 }
 0x352   :  { %v291_v15 = vpop.permute.xlu1 %290  ;;  %v304_v18 = vsel %vm130_vm1, %v302_v16, 0.0 }
 0x353   :  { %v293_v17 = vsel %vm130_vm1, %v291_v15, 0.0 }
 0x354   :  { %294 = vadd.xlane.f32.xlu0 %v293_v17 }
 0x358   :  { %305 = vadd.xlane.f32.xlu0 %v304_v18 }
 0x35b   :  { %v648_v19 = vpop.eup %647 }
 0x35c   :  { %v255_v20 = vmul.f32 %v648_v19, %v646_v7  ;;  %v617_v7 = vpack.c.bf16 %v43_v6, %v42_v4 }
 0x35e   :  { %618 = vmatpush3.bf16.msra.mxu1 %v617_v7 }
 0x35f   :  { %619 = vmatprep.subr.bf16.mxu1 %v657_v0 }
 0x360   :  { %257 = vrot.lane.b32.xlu1 %v648_v19, %s664_s12 }
 0x362   :  { %621 = vmatpush3.bf16.msra.mxu1 %v620_v10 }
 0x363   :  { %622 = vmatprep.subr.bf16.mxu1 %v657_v0 }
 0x364   :  { %265 = vrot.lane.b32.xlu1 %v648_v19, %s665_s15 }
 0x366   :  { %624 = vmatpush3.bf16.msra.mxu1 %v623_v13 }
 0x36e   :  { %261 = vrot.lane.b32.xlu0 %v648_v19, %s663_s11 }
 0x388   :  { %271 = vadd.xlane.f32.xlu1 %v270_v22 }
 0x3dc   :  { %v284_v23 = vpop.xlane.xlu1 %283 }
 0x3e0   :  { %v258_v24 = vpop.permute.xlu1 %257 }
 0x3e1   :  { %v295_v25 = vpop.xlane.xlu0 %294  ;;  %v260_v27 = vmul.f32 %v642_v60, %v258_v24 }
 0x3e3   :  { %v308_v28 = vmul.f32 %v284_v23, %v260_v27  ;;  %345 = vrot.lane.b32.xlu1 %v260_v27, %s661_s9 }
 0x3e4   :  { %v266_v30 = vpop.permute.xlu1 %265 }
 0x3e5   :  { %v306_v29 = vpop.xlane.xlu0 %305  ;;  %310 = vrot.lane.b32.xlu0 %v308_v28, %s661_s9  ;;  %v268_v33 = vmul.f32 %v644_v1, %v266_v30 }
 0x3e7   :  { %v320_v35 = vmul.f32 %v306_v29, %v268_v33  ;;  %v484_v29 = vld [vmem:[%s871_s3 + $0xf0] ss:$0 sm:$0xff] }
 0x3e9   :  { %v262_v31 = vpop.permute.xlu0 %261 }
 0x3ea   :  { %v264_v32 = vmul.f32 %v640_v59, %v262_v31 }
 0x3ec   :  { %v314_v34 = vmul.f32 %v295_v25, %v264_v32 }
 0x3ee   :  { %316 = vrot.lane.b32.xlu0 %v314_v34, %s662_s10 }
 0x3f2   :  { %322 = vrot.lane.b32.xlu0 %v320_v35, %s660_s8 }
 0x415   :  { %v272_v36 = vpop.xlane.xlu1 %271 }
 0x416   :  { %v307_v38 = vmul.f32 %v272_v36, %v255_v20 }
 0x455   :  { %v346_v50 = vpop.permute.xlu1 %345 }
 0x457   :  { %v311_v37 = vpop.permute.xlu0 %310 }
 0x458   :  { %v313_v40 = vadd.f32 %v311_v37, %v307_v38 }
 0x460   :  { %v317_v39 = vpop.permute.xlu0 %316 }
 0x461   :  { %v319_v41 = vadd.f32 %v317_v39, %v313_v40 }
 0x464   :  { %v323_v42 = vpop.permute.xlu0 %322 }
 0x465   :  { %v325_v43 = vadd.f32 %v323_v42, %v319_v41 }
 0x467   :  { %v327_v44 = vsel %vm326_vm2, %v325_v43, -inf }
 0x468   :  { %328 = vmax.xlane.f32.xlu0 %v327_v44 }
 0x47e   :  { %359 = vrot.lane.b32.xlu0 %v264_v32, %s662_s10 }
 0x4f5   :  { %v329_v45 = vpop.xlane.xlu0 %328 }
 0x4f6   :  { %v330_v46 = vsub.f32 %v325_v43, %v329_v45 }
 0x4f8   :  { %v331_v47 = vmul.f32 1.442695, %v330_v46 }
 0x4f9   :  { %v360_v54 = vpop.permute.xlu0 %359 }
 0x4fa   :  { %649 = vpow2.f32 %v331_v47 }
 0x504   :  { %v650_v48 = vpop.eup %649 }
 0x505   :  { %v333_v49 = vsel %vm326_vm2, %v650_v48, 0.0 }
 0x506   :  { %334 = vadd.xlane.f32.xlu1 %v333_v49 }
 0x517   :  { %373 = vrot.lane.b32.xlu1 %v268_v33, %s660_s8 }
 0x593   :  { %v335_v51 = vpop.xlane.xlu1 %334 }
 0x594   :  { %651 = vrcp.f32 %v335_v51 }
 0x597   :  { %v374_v57 = vpop.permute.xlu1 %373 }
 0x59e   :  { %v652_v52 = vpop.eup %651 }
 0x59f   :  { %v337_v53 = vmul.f32 %v652_v52, %v650_v48 }
 0x5a1   :  { %v348_v55 = vmul.f32 %v346_v50, %v337_v53  ;;  %v362_v56 = vmul.f32 %v360_v54, %v337_v53  ;;  %v376_v59 = vmul.f32 %v374_v57, %v337_v53  ;;  %v338_v62 = vmul.f32 %v337_v53, %v255_v20 }
 0x5a3   :  { %v349_v60 = vsel %vm326_vm2, %v348_v55, 0.0  ;;  %v363_v61 = vsel %vm326_vm2, %v362_v56, 0.0  ;;  %v377_v63 = vsel %vm326_vm2, %v376_v59, 0.0  ;;  %v339_v1 = vsel %vm326_vm2, %v338_v62, 0.0 }
 0x5a4   :  { %350 = vadd.xlane.f32.xlu1 %v349_v60  ;;  %364 = vadd.xlane.f32.xlu0 %v363_v61 }
 0x5a8   :  { %378 = vadd.xlane.f32.xlu1 %v377_v63  ;;  %340 = vadd.xlane.f32.xlu0 %v339_v1 }
 0x631   :  { %v351_v14 = vpop.xlane.xlu1 %350  ;;  %v365_v15 = vpop.xlane.xlu0 %364 }
 0x632   :  { %v352_v16 = vmul.f32 %v351_v14, %v756_v26  ;;  %v366_v17 = vmul.f32 %v365_v15, %v756_v26 }
 0x634   :  { %354 = vrot.lane.b32.xlu1 %v352_v16, %s668_s18  ;;  %368 = vrot.lane.b32.xlu0 %v366_v17, %s667_s17 }
 0x635   :  { %v379_v0 = vpop.xlane.xlu1 %378  ;;  %v341_v19 = vpop.xlane.xlu0 %340 }
 0x636   :  { %v380_v18 = vmul.f32 %v379_v0, %v756_v26  ;;  %v342_v20 = vmul.f32 %v341_v19, %v756_v26  ;;  %v19_v26 = vld [vmem:[%s874_s2] sm:$0xff] }
 0x638   :  { %382 = vrot.lane.b32.xlu1 %v380_v18, %s666_s16 }
 0x6a6   :  { %v355_v21 = vpop.permute.xlu1 %354  ;;  %v369_v23 = vpop.permute.xlu0 %368 }
 0x6a7   :  { %v357_v22 = vadd.f32 %v355_v21, %v342_v20 }
 0x6a9   :  { %v371_v24 = vadd.f32 %v369_v23, %v357_v22 }
 0x6aa   :  { %v383_v25 = vpop.permute.xlu1 %382 }
 0x6ab   :  { %v385_v27 = vadd.f32 %v383_v25, %v371_v24 }
 0x6ad   :  { %v386_v28 = vsel %vm130_vm1, %v385_v27, %v793_v58 }
 0x6ae   :  { %581 = vmatmul.mubr.msk.f32.vlgmr.msra.gmra.mrb[2].mxu1 %vm391_vm3, %v386_v28 }
 0x781   :  { %v461_v30 = vpop.f32.mrb[2].mxu1 }
 0x782   :  { %v462_v31 = vadd.f32 %v484_v29, %v461_v30  ;;  %v582_v32 = vpop.f32.mrb[3].mxu1 }
 0x784   :  { %v465_v33 = vmul.f32 %v462_v31, %v19_v26 }
 0x786   :  { %v466_v34 = vsel %vm130_vm1, %v465_v33, 0.0 }
 0x787   :  { %467 = vadd.xlane.f32.xlu1 %v466_v34 }
 0x814   :  { %v468_v35 = vpop.xlane.xlu1 %467 }
 0x815   :  { %v486_v36 = vmul.f32 -1.442695, %v468_v35 }
 0x817   :  { %653 = vpow2.f32 %v486_v36 }
 0x821   :  { %v654_v58 = vpop.eup %653 }
 0x822   :  { %v472_v37 = vadd.f32 1.0, %v654_v58 }
 0x824   :  { %655 = vrcp.f32 %v472_v37 }
 0x82e   :  { %v656_v38 = vpop.eup %655 }
 0x82f   :  { %476 = vst.msk [vmem:[%s875_s4] sm:$0xff] %vm475_vm4, %v656_v38 }

</bundles_post_ra>
